<compile_context>
chip_gen: v6e
topology: v6e:2x2x1
jax: 0.10.0
libtpu: 0.0.40
codegen_flags: <defaults>
</compile_context>

<pallas_src>
import jax
import jax.numpy as jnp
from jax.experimental import pallas as pl
from jax.experimental.pallas import tpu as pltpu

EPS = 1e-5


def double_conv_kernel(x_ref, w1_ref, w2_ref, bn_ref, rep_ref, repT_ref,
                       o_ref, xpad_ref, mid_ref):
    """Fused (conv3x3 pad=1 -> BN(batch stats) -> ReLU) x 2.

    Layout: activations are (rows, W*C), lane index = w*C + c.

    x_ref   : (N, H, W*Cin)        unpadded input
    w1_ref  : (3, W*Cin,  W*Cout)  stage-1 band weights (per kh tap, W halo folded in)
    w2_ref  : (3, W*Cout, W*Cout)  stage-2 band weights
    bn_ref  : (4, W*Cout)          [gamma1, beta1, gamma2, beta2] pre-broadcast to lanes
    rep_ref : (Cout, W*Cout)       channel -> lane replication matrix
    repT_ref: (W*Cout, Cout)       lane -> channel fold matrix (rep.T)
    o_ref   : (N*H, W*Cout)        output (lane-dense)
    xpad_ref: (N, H+2, W*Cin)      VMEM scratch (H halo rows + input)
    mid_ref : (N, H+2, W*Cout)     VMEM scratch (H halo rows + stage-1 output)

    Conv bias is intentionally omitted: training-mode BN subtracts it back out.
    """
    N, H, WCin = x_ref.shape
    WCout = o_ref.shape[-1]
    Cout = rep_ref.shape[0]
    W = WCout // Cout
    inv_count = 1.0 / float(N * H * W)

    def conv_bn_relu(src_ref, wm_ref, g_l, be_l, k):
        # 3x3 conv == 3 band matmuls over sublane(H)-shifted row blocks,
        # written as one accumulation chain (MXU-resident partial sums).
        r0 = src_ref[:, 0:H, :].reshape(N * H, k)
        r1 = src_ref[:, 1:H + 1, :].reshape(N * H, k)
        r2 = src_ref[:, 2:H + 2, :].reshape(N * H, k)
        acc = (jnp.dot(r0, wm_ref[0], preferred_element_type=jnp.float32)
               + jnp.dot(r1, wm_ref[1], preferred_element_type=jnp.float32)
               + jnp.dot(r2, wm_ref[2], preferred_element_type=jnp.float32))

        # One-pass BatchNorm batch stats (biased var), PyTorch train semantics.
        # TODO(synk): switch to shifted / two-pass accumulation at real N*H*W.
        stats = jnp.concatenate(
            [jnp.sum(acc, axis=0, keepdims=True),
             jnp.sum(acc * acc, axis=0, keepdims=True)], axis=0)   # (2, W*Cout)
        cstats = jnp.dot(stats, repT_ref[...],
                         preferred_element_type=jnp.float32)       # (2, Cout)
        mean = cstats[0:1, :] * inv_count
        var = cstats[1:2, :] * inv_count - mean * mean
        # Broadcast [mean, 1/sqrt(var+eps)] back onto the W-interleaved lanes.
        cb = jnp.concatenate([mean, jax.lax.rsqrt(var + EPS)], axis=0)  # (2, Cout)
        lanes = jnp.dot(cb, rep_ref[...],
                        preferred_element_type=jnp.float32)        # (2, W*Cout)
        scale_l = g_l * lanes[1:2, :]
        shift_l = be_l - lanes[0:1, :] * scale_l
        return jnp.maximum(acc * scale_l + shift_l, 0.0)

    # --- stage 1: zero only the H-halo rows, interior written once ---------
    zrow_in = jnp.zeros((N, 1, WCin), jnp.float32)
    xpad_ref[:, 0:1, :] = zrow_in
    xpad_ref[:, H + 1:H + 2, :] = zrow_in
    xpad_ref[:, 1:H + 1, :] = x_ref[...]
    y1 = conv_bn_relu(xpad_ref, w1_ref, bn_ref[0:1, :], bn_ref[1:2, :], WCin)

    # --- stage 2: stage-1 output stored straight into the mid interior -----
    zrow_mid = jnp.zeros((N, 1, WCout), jnp.float32)
    mid_ref[:, 0:1, :] = zrow_mid
    mid_ref[:, H + 1:H + 2, :] = zrow_mid
    mid_ref[:, 1:H + 1, :] = y1.reshape(N, H, WCout)
    o_ref[...] = conv_bn_relu(mid_ref, w2_ref, bn_ref[2:3, :], bn_ref[3:4, :],
                              WCout)


def _lower_conv_weight(w_hwio, W):
    """Lower a (3, 3, Ci, Co) conv kernel into 3 band matrices (W*Ci, W*Co).

    mats[kh][p*Ci + ci, w*Co + co] = sum_{kw : p == w+kw-1, 0<=p<W} w_hwio[kh, kw, ci, co]

    Out-of-range (w+kw-1) taps are simply dropped, which is exactly zero
    padding in W — so the activation rows need no lane halo at all.
    """
    KH, KW, Ci, Co = w_hwio.shape
    mats = []
    for kh in range(KH):
        m = jnp.zeros((W, Ci, W, Co), w_hwio.dtype)
        for kw in range(KW):
            sel = jnp.eye(W, W, k=kw - 1, dtype=w_hwio.dtype)  # sel[w, w+kw-1] = 1
            m = m + jnp.einsum("wp,io->piwo", sel, w_hwio[kh, kw])
        mats.append(m.reshape(W * Ci, W * Co))
    return jnp.stack(mats, axis=0)                              # (3, W*Ci, W*Co)


@jax.jit
def double_conv_forward(x_nchw, params):
    """Pallas implementation of double_conv.forward (NCHW in / NCHW out)."""
    (w1, b1, g1, be1, w2, b2, g2, be2) = params
    del b1, b2  # exactly cancelled by training-mode BatchNorm
    N, Cin, H, W = x_nchw.shape
    Cout = w1.shape[-1]
    Hp = H + 2

    # Layout glue at the PyTorch boundary: NCHW -> (N, H, W*Cin).
    # TODO(synk): elide these transposes if the surrounding model stays NHWC.
    x = jnp.transpose(x_nchw, (0, 2, 3, 1)).reshape(N, H, W * Cin)

    w1m = _lower_conv_weight(w1, W)                             # (3, W*Cin,  W*Cout)
    w2m = _lower_conv_weight(w2, W)                             # (3, W*Cout, W*Cout)
    rep = jnp.tile(jnp.eye(Cout, dtype=jnp.float32), (1, W))    # (Cout, W*Cout)
    repT = rep.T                                                # (W*Cout, Cout)
    # Pack the four BN vectors into one lane-broadcast operand (1 DMA).
    bn_lanes = jnp.stack([jnp.tile(g1, W), jnp.tile(be1, W),
                          jnp.tile(g2, W), jnp.tile(be2, W)], axis=0)  # (4, W*Cout)

    out_flat = pl.pallas_call(
        double_conv_kernel,
        out_shape=jax.ShapeDtypeStruct((N * H, W * Cout), jnp.float32),
        grid=(1,),
        in_specs=[
            pl.BlockSpec((N, H, W * Cin), lambda i: (0, 0, 0)),
            pl.BlockSpec((3, W * Cin, W * Cout), lambda i: (0, 0, 0)),
            pl.BlockSpec((3, W * Cout, W * Cout), lambda i: (0, 0, 0)),
            pl.BlockSpec((4, W * Cout), lambda i: (0, 0)),
            pl.BlockSpec((Cout, W * Cout), lambda i: (0, 0)),
            pl.BlockSpec((W * Cout, Cout), lambda i: (0, 0)),
        ],
        out_specs=pl.BlockSpec((N * H, W * Cout), lambda i: (0, 0)),
        scratch_shapes=[
            pltpu.VMEM((N, Hp, W * Cin), jnp.float32),
            pltpu.VMEM((N, Hp, W * Cout), jnp.float32),
        ],
        compiler_params=pltpu.CompilerParams(
            dimension_semantics=("arbitrary",),
            vmem_limit_bytes=32 * 1024 * 1024),
    )(x, w1m, w2m, bn_lanes, rep, repT)

    # (N*H, W*Cout) -> NHWC -> NCHW
    return jnp.transpose(out_flat.reshape(N, H, W, Cout), (0, 3, 1, 2))


def init_params(key, in_ch, out_ch):
    """Deterministic parameter init mirroring the module's shapes."""
    ks = jax.random.split(key, 8)
    # Conv2d weights are (out, in, 3, 3) in PyTorch; kernel uses HWIO.
    w1_oihw = 0.1 * jax.random.normal(ks[0], (out_ch, in_ch, 3, 3), jnp.float32)
    b1 = 0.1 * jax.random.normal(ks[1], (out_ch,), jnp.float32)
    w2_oihw = 0.1 * jax.random.normal(ks[2], (out_ch, out_ch, 3, 3), jnp.float32)
    b2 = 0.1 * jax.random.normal(ks[3], (out_ch,), jnp.float32)
    # BatchNorm2d affine params (gamma, beta), non-trivial but deterministic.
    g1 = 1.0 + 0.1 * jax.random.normal(ks[4], (out_ch,), jnp.float32)
    be1 = 0.1 * jax.random.normal(ks[5], (out_ch,), jnp.float32)
    g2 = 1.0 + 0.1 * jax.random.normal(ks[6], (out_ch,), jnp.float32)
    be2 = 0.1 * jax.random.normal(ks[7], (out_ch,), jnp.float32)
    w1 = jnp.transpose(w1_oihw, (2, 3, 1, 0))  # HWIO
    w2 = jnp.transpose(w2_oihw, (2, 3, 1, 0))  # HWIO
    return (w1, b1, g1, be1, w2, b2, g2, be2), (w1_oihw, w2_oihw)


def reference_double_conv(x_nchw, params_oihw, params):
    """Pure-JAX reference (same semantics as the PyTorch module in train mode)."""
    (w1_oihw, w2_oihw) = params_oihw
    (_, b1, g1, be1, _, b2, g2, be2) = params

    def conv(x, w, b):
        y = jax.lax.conv_general_dilated(
            x, w, window_strides=(1, 1), padding="SAME",
            dimension_numbers=("NCHW", "OIHW", "NCHW"))
        return y + b[None, :, None, None]

    def bn_relu(x, g, be):
        mean = jnp.mean(x, axis=(0, 2, 3), keepdims=True)
        var = jnp.mean((x - mean) ** 2, axis=(0, 2, 3), keepdims=True)
        y = (x - mean) * jax.lax.rsqrt(var + EPS)
        y = y * g[None, :, None, None] + be[None, :, None, None]
        return jnp.maximum(y, 0.0)

    x = bn_relu(conv(x_nchw, w1_oihw, b1), g1, be1)
    x = bn_relu(conv(x, w2_oihw, b2), g2, be2)
    return x


if __name__ == "__main__":
    in_ch, out_ch = 4, 8
    N, H, W = 2, 16, 16

    key = jax.random.PRNGKey(0)
    k_x, k_p = jax.random.split(key)
    x = jax.random.normal(k_x, (N, in_ch, H, W), jnp.float32)  # NCHW like PyTorch

    params, params_oihw = init_params(k_p, in_ch, out_ch)

    out = double_conv_forward(x, params)
    out = jax.block_until_ready(out)

    ref = reference_double_conv(x, params_oihw, params)
    ref = jax.block_until_ready(ref)

    assert out.shape == (N, out_ch, H, W), out.shape
    assert jnp.allclose(out, ref, rtol=1e-3, atol=1e-3), (
        float(jnp.max(jnp.abs(out - ref))))

    print("KERNEL_OK")
</pallas_src>

<mosaic_0001>
module attributes {stable_mosaic.version = 11 : i64} {
  func.func @double_conv_kernel(%arg0: i32, %arg1: memref<2x16x64xf32, #tpu.memory_space<vmem>>, %arg2: memref<3x64x128xf32, #tpu.memory_space<vmem>>, %arg3: memref<3x128x128xf32, #tpu.memory_space<vmem>>, %arg4: memref<4x128xf32, #tpu.memory_space<vmem>>, %arg5: memref<8x128xf32, #tpu.memory_space<vmem>>, %arg6: memref<128x8xf32, #tpu.memory_space<vmem>>, %arg7: memref<32x128xf32, #tpu.memory_space<vmem>>, %arg8: memref<2x18x64xf32, #tpu.memory_space<vmem>>, %arg9: memref<2x18x128xf32, #tpu.memory_space<vmem>>) attributes {dimension_semantics = [#tpu.dimension_semantics<arbitrary>], iteration_bounds = array<i64: 1>, scalar_prefetch = 0 : i64, scratch_operands = 2 : i64, tpu.core_type = #tpu.core_type<tc>, window_params = [{pipeline_mode = #tpu.pipeline_mode<synchronous>, transform_indices = @transform_0, window_bounds = array<i64: 2, 16, 64>}, {pipeline_mode = #tpu.pipeline_mode<synchronous>, transform_indices = @transform_1, window_bounds = array<i64: 3, 64, 128>}, {pipeline_mode = #tpu.pipeline_mode<synchronous>, transform_indices = @transform_2, window_bounds = array<i64: 3, 128, 128>}, {pipeline_mode = #tpu.pipeline_mode<synchronous>, transform_indices = @transform_3, window_bounds = array<i64: 4, 128>}, {pipeline_mode = #tpu.pipeline_mode<synchronous>, transform_indices = @transform_4, window_bounds = array<i64: 8, 128>}, {pipeline_mode = #tpu.pipeline_mode<synchronous>, transform_indices = @transform_5, window_bounds = array<i64: 128, 8>}, {pipeline_mode = #tpu.pipeline_mode<synchronous>, transform_indices = @transform_6, window_bounds = array<i64: 32, 128>}]} {
    %cst = arith.constant 0.000000e+00 : f32
    %0 = vector.broadcast %cst : f32 to vector<2x1x64xf32>
    %c0 = arith.constant 0 : index
    %c0_0 = arith.constant 0 : index
    %c0_1 = arith.constant 0 : index
    %1 = vector.load %arg8[%c0, %c0_0, %c0_1] : memref<2x18x64xf32, #tpu.memory_space<vmem>>, vector<2x1x64xf32>
    tpu.vector_store %arg8[%c0, %c0_0, %c0_1], %0 {strides = array<i32>} : memref<2x18x64xf32, #tpu.memory_space<vmem>>, vector<2x1x64xf32>,
    %c0_2 = arith.constant 0 : index
    %c17 = arith.constant 17 : index
    %c0_3 = arith.constant 0 : index
    %2 = vector.load %arg8[%c0_2, %c17, %c0_3] : memref<2x18x64xf32, #tpu.memory_space<vmem>>, vector<2x1x64xf32>
    tpu.vector_store %arg8[%c0_2, %c17, %c0_3], %0 {strides = array<i32>} : memref<2x18x64xf32, #tpu.memory_space<vmem>>, vector<2x1x64xf32>,
    %c0_4 = arith.constant 0 : index
    %c0_5 = arith.constant 0 : index
    %c0_6 = arith.constant 0 : index
    %3 = vector.load %arg1[%c0_4, %c0_5, %c0_6] : memref<2x16x64xf32, #tpu.memory_space<vmem>>, vector<2x16x64xf32>
    %c0_7 = arith.constant 0 : index
    %c1 = arith.constant 1 : index
    %c0_8 = arith.constant 0 : index
    %4 = vector.load %arg8[%c0_7, %c1, %c0_8] : memref<2x18x64xf32, #tpu.memory_space<vmem>>, vector<2x16x64xf32>
    tpu.vector_store %arg8[%c0_7, %c1, %c0_8], %3 {strides = array<i32>} : memref<2x18x64xf32, #tpu.memory_space<vmem>>, vector<2x16x64xf32>,
    %c0_9 = arith.constant 0 : index
    %c0_10 = arith.constant 0 : index
    %5 = vector.load %arg4[%c0_9, %c0_10] : memref<4x128xf32, #tpu.memory_space<vmem>>, vector<1x128xf32>
    %c1_11 = arith.constant 1 : index
    %c0_12 = arith.constant 0 : index
    %6 = vector.load %arg4[%c1_11, %c0_12] : memref<4x128xf32, #tpu.memory_space<vmem>>, vector<1x128xf32>
    %c0_13 = arith.constant 0 : index
    %c0_14 = arith.constant 0 : index
    %c0_15 = arith.constant 0 : index
    %7 = vector.load %arg8[%c0_13, %c0_14, %c0_15] : memref<2x18x64xf32, #tpu.memory_space<vmem>>, vector<2x16x64xf32>
    %8 = vector.shape_cast %7 : vector<2x16x64xf32> to vector<32x64xf32>
    %c0_16 = arith.constant 0 : index
    %c1_17 = arith.constant 1 : index
    %c0_18 = arith.constant 0 : index
    %9 = vector.load %arg8[%c0_16, %c1_17, %c0_18] : memref<2x18x64xf32, #tpu.memory_space<vmem>>, vector<2x16x64xf32>
    %10 = vector.shape_cast %9 : vector<2x16x64xf32> to vector<32x64xf32>
    %c0_19 = arith.constant 0 : index
    %c2 = arith.constant 2 : index
    %c0_20 = arith.constant 0 : index
    %11 = vector.load %arg8[%c0_19, %c2, %c0_20] : memref<2x18x64xf32, #tpu.memory_space<vmem>>, vector<2x16x64xf32>
    %12 = vector.shape_cast %11 : vector<2x16x64xf32> to vector<32x64xf32>
    %c0_21 = arith.constant 0 : index
    %c0_22 = arith.constant 0 : index
    %c0_23 = arith.constant 0 : index
    %13 = vector.load %arg2[%c0_21, %c0_22, %c0_23] : memref<3x64x128xf32, #tpu.memory_space<vmem>>, vector<1x64x128xf32>
    %14 = vector.shape_cast %13 : vector<1x64x128xf32> to vector<64x128xf32>
    %cst_24 = arith.constant dense<0.000000e+00> : vector<32x128xf32>
    %15 = tpu.matmul %8, %14, %cst_24 {dimension_numbers = #tpu.dot_dimension_numbers<[1], [0], [0], [1], [0, 0, 1, 1], [], []>} : vector<32x64xf32>, vector<64x128xf32>, vector<32x128xf32> -> vector<32x128xf32>
    %c1_25 = arith.constant 1 : index
    %c0_26 = arith.constant 0 : index
    %c0_27 = arith.constant 0 : index
    %16 = vector.load %arg2[%c1_25, %c0_26, %c0_27] : memref<3x64x128xf32, #tpu.memory_space<vmem>>, vector<1x64x128xf32>
    %17 = vector.shape_cast %16 : vector<1x64x128xf32> to vector<64x128xf32>
    %cst_28 = arith.constant dense<0.000000e+00> : vector<32x128xf32>
    %18 = tpu.matmul %10, %17, %cst_28 {dimension_numbers = #tpu.dot_dimension_numbers<[1], [0], [0], [1], [0, 0, 1, 1], [], []>} : vector<32x64xf32>, vector<64x128xf32>, vector<32x128xf32> -> vector<32x128xf32>
    %19 = arith.addf %15, %18 : vector<32x128xf32>
    %c2_29 = arith.constant 2 : index
    %c0_30 = arith.constant 0 : index
    %c0_31 = arith.constant 0 : index
    %20 = vector.load %arg2[%c2_29, %c0_30, %c0_31] : memref<3x64x128xf32, #tpu.memory_space<vmem>>, vector<1x64x128xf32>
    %21 = vector.shape_cast %20 : vector<1x64x128xf32> to vector<64x128xf32>
    %cst_32 = arith.constant dense<0.000000e+00> : vector<32x128xf32>
    %22 = tpu.matmul %12, %21, %cst_32 {dimension_numbers = #tpu.dot_dimension_numbers<[1], [0], [0], [1], [0, 0, 1, 1], [], []>} : vector<32x64xf32>, vector<64x128xf32>, vector<32x128xf32> -> vector<32x128xf32>
    %23 = arith.addf %19, %22 : vector<32x128xf32>
    %cst_33 = arith.constant dense<0.000000e+00> : vector<128xf32>
    %24 = vector.multi_reduction <add>, %23, %cst_33 [0] : vector<32x128xf32> to vector<128xf32>
    %25 = vector.shape_cast %24 : vector<128xf32> to vector<1x128xf32>
    %26 = arith.mulf %23, %23 : vector<32x128xf32>
    %cst_34 = arith.constant dense<0.000000e+00> : vector<128xf32>
    %27 = vector.multi_reduction <add>, %26, %cst_34 [0] : vector<32x128xf32> to vector<128xf32>
    %28 = vector.shape_cast %27 : vector<128xf32> to vector<1x128xf32>
    %29 = tpu.concatenate %25, %28 in 0 : vector<1x128xf32>, vector<1x128xf32> -> vector<2x128xf32>
    %c0_35 = arith.constant 0 : index
    %c0_36 = arith.constant 0 : index
    %30 = vector.load %arg6[%c0_35, %c0_36] : memref<128x8xf32, #tpu.memory_space<vmem>>, vector<128x8xf32>
    %cst_37 = arith.constant dense<0.000000e+00> : vector<2x8xf32>
    %31 = tpu.matmul %29, %30, %cst_37 {dimension_numbers = #tpu.dot_dimension_numbers<[1], [0], [0], [1], [0, 0, 1, 1], [], []>} : vector<2x128xf32>, vector<128x8xf32>, vector<2x8xf32> -> vector<2x8xf32>
    %32 = vector.extract_strided_slice %31 {offsets = [0, 0], sizes = [1, 8], strides = [1, 1]} : vector<2x8xf32> to vector<1x8xf32>
    %cst_38 = arith.constant 0.001953125 : f32
    %33 = vector.broadcast %cst_38 : f32 to vector<1x8xf32>
    %34 = arith.mulf %32, %33 : vector<1x8xf32>
    %35 = vector.extract_strided_slice %31 {offsets = [1, 0], sizes = [1, 8], strides = [1, 1]} : vector<2x8xf32> to vector<1x8xf32>
    %cst_39 = arith.constant 0.001953125 : f32
    %36 = vector.broadcast %cst_39 : f32 to vector<1x8xf32>
    %37 = arith.mulf %35, %36 : vector<1x8xf32>
    %38 = arith.mulf %34, %34 : vector<1x8xf32>
    %39 = arith.subf %37, %38 : vector<1x8xf32>
    %cst_40 = arith.constant 9.99999974E-6 : f32
    %40 = vector.broadcast %cst_40 : f32 to vector<1x8xf32>
    %41 = arith.addf %39, %40 : vector<1x8xf32>
    %42 = math.rsqrt %41 : vector<1x8xf32>
    %43 = tpu.concatenate %34, %42 in 0 : vector<1x8xf32>, vector<1x8xf32> -> vector<2x8xf32>
    %c0_41 = arith.constant 0 : index
    %c0_42 = arith.constant 0 : index
    %44 = vector.load %arg5[%c0_41, %c0_42] : memref<8x128xf32, #tpu.memory_space<vmem>>, vector<8x128xf32>
    %cst_43 = arith.constant dense<0.000000e+00> : vector<2x128xf32>
    %45 = tpu.matmul %43, %44, %cst_43 {dimension_numbers = #tpu.dot_dimension_numbers<[1], [0], [0], [1], [0, 0, 1, 1], [], []>} : vector<2x8xf32>, vector<8x128xf32>, vector<2x128xf32> -> vector<2x128xf32>
    %46 = vector.extract_strided_slice %45 {offsets = [1, 0], sizes = [1, 128], strides = [1, 1]} : vector<2x128xf32> to vector<1x128xf32>
    %47 = arith.mulf %5, %46 : vector<1x128xf32>
    %48 = vector.extract_strided_slice %45 {offsets = [0, 0], sizes = [1, 128], strides = [1, 1]} : vector<2x128xf32> to vector<1x128xf32>
    %49 = arith.mulf %48, %47 : vector<1x128xf32>
    %50 = arith.subf %6, %49 : vector<1x128xf32>
    %51 = vector.broadcast %47 : vector<1x128xf32> to vector<32x128xf32>
    %52 = arith.mulf %23, %51 : vector<32x128xf32>
    %53 = vector.broadcast %50 : vector<1x128xf32> to vector<32x128xf32>
    %54 = arith.addf %52, %53 : vector<32x128xf32>
    %cst_44 = arith.constant 0.000000e+00 : f32
    %55 = vector.broadcast %cst_44 : f32 to vector<32x128xf32>
    %56 = arith.maximumf %54, %55 : vector<32x128xf32>
    %cst_45 = arith.constant 0.000000e+00 : f32
    %57 = vector.broadcast %cst_45 : f32 to vector<2x1x128xf32>
    %c0_46 = arith.constant 0 : index
    %c0_47 = arith.constant 0 : index
    %c0_48 = arith.constant 0 : index
    %58 = vector.load %arg9[%c0_46, %c0_47, %c0_48] : memref<2x18x128xf32, #tpu.memory_space<vmem>>, vector<2x1x128xf32>
    tpu.vector_store %arg9[%c0_46, %c0_47, %c0_48], %57 {strides = array<i32>} : memref<2x18x128xf32, #tpu.memory_space<vmem>>, vector<2x1x128xf32>,
    %c0_49 = arith.constant 0 : index
    %c17_50 = arith.constant 17 : index
    %c0_51 = arith.constant 0 : index
    %59 = vector.load %arg9[%c0_49, %c17_50, %c0_51] : memref<2x18x128xf32, #tpu.memory_space<vmem>>, vector<2x1x128xf32>
    tpu.vector_store %arg9[%c0_49, %c17_50, %c0_51], %57 {strides = array<i32>} : memref<2x18x128xf32, #tpu.memory_space<vmem>>, vector<2x1x128xf32>,
    %60 = vector.shape_cast %56 : vector<32x128xf32> to vector<2x16x128xf32>
    %c0_52 = arith.constant 0 : index
    %c1_53 = arith.constant 1 : index
    %c0_54 = arith.constant 0 : index
    %61 = vector.load %arg9[%c0_52, %c1_53, %c0_54] : memref<2x18x128xf32, #tpu.memory_space<vmem>>, vector<2x16x128xf32>
    tpu.vector_store %arg9[%c0_52, %c1_53, %c0_54], %60 {strides = array<i32>} : memref<2x18x128xf32, #tpu.memory_space<vmem>>, vector<2x16x128xf32>,
    %c2_55 = arith.constant 2 : index
    %c0_56 = arith.constant 0 : index
    %62 = vector.load %arg4[%c2_55, %c0_56] : memref<4x128xf32, #tpu.memory_space<vmem>>, vector<1x128xf32>
    %c3 = arith.constant 3 : index
    %c0_57 = arith.constant 0 : index
    %63 = vector.load %arg4[%c3, %c0_57] : memref<4x128xf32, #tpu.memory_space<vmem>>, vector<1x128xf32>
    %c0_58 = arith.constant 0 : index
    %c0_59 = arith.constant 0 : index
    %c0_60 = arith.constant 0 : index
    %64 = vector.load %arg9[%c0_58, %c0_59, %c0_60] : memref<2x18x128xf32, #tpu.memory_space<vmem>>, vector<2x16x128xf32>
    %65 = vector.shape_cast %64 : vector<2x16x128xf32> to vector<32x128xf32>
    %c0_61 = arith.constant 0 : index
    %c1_62 = arith.constant 1 : index
    %c0_63 = arith.constant 0 : index
    %66 = vector.load %arg9[%c0_61, %c1_62, %c0_63] : memref<2x18x128xf32, #tpu.memory_space<vmem>>, vector<2x16x128xf32>
    %67 = vector.shape_cast %66 : vector<2x16x128xf32> to vector<32x128xf32>
    %c0_64 = arith.constant 0 : index
    %c2_65 = arith.constant 2 : index
    %c0_66 = arith.constant 0 : index
    %68 = vector.load %arg9[%c0_64, %c2_65, %c0_66] : memref<2x18x128xf32, #tpu.memory_space<vmem>>, vector<2x16x128xf32>
    %69 = vector.shape_cast %68 : vector<2x16x128xf32> to vector<32x128xf32>
    %c0_67 = arith.constant 0 : index
    %c0_68 = arith.constant 0 : index
    %c0_69 = arith.constant 0 : index
    %70 = vector.load %arg3[%c0_67, %c0_68, %c0_69] : memref<3x128x128xf32, #tpu.memory_space<vmem>>, vector<1x128x128xf32>
    %71 = vector.shape_cast %70 : vector<1x128x128xf32> to vector<128x128xf32>
    %cst_70 = arith.constant dense<0.000000e+00> : vector<32x128xf32>
    %72 = tpu.matmul %65, %71, %cst_70 {dimension_numbers = #tpu.dot_dimension_numbers<[1], [0], [0], [1], [0, 0, 1, 1], [], []>} : vector<32x128xf32>, vector<128x128xf32>, vector<32x128xf32> -> vector<32x128xf32>
    %c1_71 = arith.constant 1 : index
    %c0_72 = arith.constant 0 : index
    %c0_73 = arith.constant 0 : index
    %73 = vector.load %arg3[%c1_71, %c0_72, %c0_73] : memref<3x128x128xf32, #tpu.memory_space<vmem>>, vector<1x128x128xf32>
    %74 = vector.shape_cast %73 : vector<1x128x128xf32> to vector<128x128xf32>
    %cst_74 = arith.constant dense<0.000000e+00> : vector<32x128xf32>
    %75 = tpu.matmul %67, %74, %cst_74 {dimension_numbers = #tpu.dot_dimension_numbers<[1], [0], [0], [1], [0, 0, 1, 1], [], []>} : vector<32x128xf32>, vector<128x128xf32>, vector<32x128xf32> -> vector<32x128xf32>
    %76 = arith.addf %72, %75 : vector<32x128xf32>
    %c2_75 = arith.constant 2 : index
    %c0_76 = arith.constant 0 : index
    %c0_77 = arith.constant 0 : index
    %77 = vector.load %arg3[%c2_75, %c0_76, %c0_77] : memref<3x128x128xf32, #tpu.memory_space<vmem>>, vector<1x128x128xf32>
    %78 = vector.shape_cast %77 : vector<1x128x128xf32> to vector<128x128xf32>
    %cst_78 = arith.constant dense<0.000000e+00> : vector<32x128xf32>
    %79 = tpu.matmul %69, %78, %cst_78 {dimension_numbers = #tpu.dot_dimension_numbers<[1], [0], [0], [1], [0, 0, 1, 1], [], []>} : vector<32x128xf32>, vector<128x128xf32>, vector<32x128xf32> -> vector<32x128xf32>
    %80 = arith.addf %76, %79 : vector<32x128xf32>
    %cst_79 = arith.constant dense<0.000000e+00> : vector<128xf32>
    %81 = vector.multi_reduction <add>, %80, %cst_79 [0] : vector<32x128xf32> to vector<128xf32>
    %82 = vector.shape_cast %81 : vector<128xf32> to vector<1x128xf32>
    %83 = arith.mulf %80, %80 : vector<32x128xf32>
    %cst_80 = arith.constant dense<0.000000e+00> : vector<128xf32>
    %84 = vector.multi_reduction <add>, %83, %cst_80 [0] : vector<32x128xf32> to vector<128xf32>
    %85 = vector.shape_cast %84 : vector<128xf32> to vector<1x128xf32>
    %86 = tpu.concatenate %82, %85 in 0 : vector<1x128xf32>, vector<1x128xf32> -> vector<2x128xf32>
    %c0_81 = arith.constant 0 : index
    %c0_82 = arith.constant 0 : index
    %87 = vector.load %arg6[%c0_81, %c0_82] : memref<128x8xf32, #tpu.memory_space<vmem>>, vector<128x8xf32>
    %cst_83 = arith.constant dense<0.000000e+00> : vector<2x8xf32>
    %88 = tpu.matmul %86, %87, %cst_83 {dimension_numbers = #tpu.dot_dimension_numbers<[1], [0], [0], [1], [0, 0, 1, 1], [], []>} : vector<2x128xf32>, vector<128x8xf32>, vector<2x8xf32> -> vector<2x8xf32>
    %89 = vector.extract_strided_slice %88 {offsets = [0, 0], sizes = [1, 8], strides = [1, 1]} : vector<2x8xf32> to vector<1x8xf32>
    %cst_84 = arith.constant 0.001953125 : f32
    %90 = vector.broadcast %cst_84 : f32 to vector<1x8xf32>
    %91 = arith.mulf %89, %90 : vector<1x8xf32>
    %92 = vector.extract_strided_slice %88 {offsets = [1, 0], sizes = [1, 8], strides = [1, 1]} : vector<2x8xf32> to vector<1x8xf32>
    %cst_85 = arith.constant 0.001953125 : f32
    %93 = vector.broadcast %cst_85 : f32 to vector<1x8xf32>
    %94 = arith.mulf %92, %93 : vector<1x8xf32>
    %95 = arith.mulf %91, %91 : vector<1x8xf32>
    %96 = arith.subf %94, %95 : vector<1x8xf32>
    %cst_86 = arith.constant 9.99999974E-6 : f32
    %97 = vector.broadcast %cst_86 : f32 to vector<1x8xf32>
    %98 = arith.addf %96, %97 : vector<1x8xf32>
    %99 = math.rsqrt %98 : vector<1x8xf32>
    %100 = tpu.concatenate %91, %99 in 0 : vector<1x8xf32>, vector<1x8xf32> -> vector<2x8xf32>
    %c0_87 = arith.constant 0 : index
    %c0_88 = arith.constant 0 : index
    %101 = vector.load %arg5[%c0_87, %c0_88] : memref<8x128xf32, #tpu.memory_space<vmem>>, vector<8x128xf32>
    %cst_89 = arith.constant dense<0.000000e+00> : vector<2x128xf32>
    %102 = tpu.matmul %100, %101, %cst_89 {dimension_numbers = #tpu.dot_dimension_numbers<[1], [0], [0], [1], [0, 0, 1, 1], [], []>} : vector<2x8xf32>, vector<8x128xf32>, vector<2x128xf32> -> vector<2x128xf32>
    %103 = vector.extract_strided_slice %102 {offsets = [1, 0], sizes = [1, 128], strides = [1, 1]} : vector<2x128xf32> to vector<1x128xf32>
    %104 = arith.mulf %62, %103 : vector<1x128xf32>
    %105 = vector.extract_strided_slice %102 {offsets = [0, 0], sizes = [1, 128], strides = [1, 1]} : vector<2x128xf32> to vector<1x128xf32>
    %106 = arith.mulf %105, %104 : vector<1x128xf32>
    %107 = arith.subf %63, %106 : vector<1x128xf32>
    %108 = vector.broadcast %104 : vector<1x128xf32> to vector<32x128xf32>
    %109 = arith.mulf %80, %108 : vector<32x128xf32>
    %110 = vector.broadcast %107 : vector<1x128xf32> to vector<32x128xf32>
    %111 = arith.addf %109, %110 : vector<32x128xf32>
    %cst_90 = arith.constant 0.000000e+00 : f32
    %112 = vector.broadcast %cst_90 : f32 to vector<32x128xf32>
    %113 = arith.maximumf %111, %112 : vector<32x128xf32>
    %c0_91 = arith.constant 0 : index
    %c0_92 = arith.constant 0 : index
    %114 = vector.load %arg7[%c0_91, %c0_92] : memref<32x128xf32, #tpu.memory_space<vmem>>, vector<32x128xf32>
    tpu.vector_store %arg7[%c0_91, %c0_92], %113 {strides = array<i32>} : memref<32x128xf32, #tpu.memory_space<vmem>>, vector<32x128xf32>,
    return
  }
  func.func @transform_0(%arg0: i32) -> (i32, i32, i32) {
    %c0_i32 = arith.constant 0 : i32
    %c0_i32_0 = arith.constant 0 : i32
    %c0_i32_1 = arith.constant 0 : i32
    %c0_i32_2 = arith.constant 0 : i32
    return %c0_i32, %c0_i32_0, %c0_i32_1 : i32, i32, i32
  }
  func.func @transform_1(%arg0: i32) -> (i32, i32, i32) {
    %c0_i32 = arith.constant 0 : i32
    %c0_i32_0 = arith.constant 0 : i32
    %c0_i32_1 = arith.constant 0 : i32
    %c0_i32_2 = arith.constant 0 : i32
    return %c0_i32, %c0_i32_0, %c0_i32_1 : i32, i32, i32
  }
  func.func @transform_2(%arg0: i32) -> (i32, i32, i32) {
    %c0_i32 = arith.constant 0 : i32
    %c0_i32_0 = arith.constant 0 : i32
    %c0_i32_1 = arith.constant 0 : i32
    %c0_i32_2 = arith.constant 0 : i32
    return %c0_i32, %c0_i32_0, %c0_i32_1 : i32, i32, i32
  }
  func.func @transform_3(%arg0: i32) -> (i32, i32) {
    %c0_i32 = arith.constant 0 : i32
    %c0_i32_0 = arith.constant 0 : i32
    %c0_i32_1 = arith.constant 0 : i32
    return %c0_i32, %c0_i32_0 : i32, i32
  }
  func.func @transform_4(%arg0: i32) -> (i32, i32) {
    %c0_i32 = arith.constant 0 : i32
    %c0_i32_0 = arith.constant 0 : i32
    %c0_i32_1 = arith.constant 0 : i32
    return %c0_i32, %c0_i32_0 : i32, i32
  }
  func.func @transform_5(%arg0: i32) -> (i32, i32) {
    %c0_i32 = arith.constant 0 : i32
    %c0_i32_0 = arith.constant 0 : i32
    %c0_i32_1 = arith.constant 0 : i32
    return %c0_i32, %c0_i32_0 : i32, i32
  }
  func.func @transform_6(%arg0: i32) -> (i32, i32) {
    %c0_i32 = arith.constant 0 : i32
    %c0_i32_0 = arith.constant 0 : i32
    %c0_i32_1 = arith.constant 0 : i32
    return %c0_i32, %c0_i32_0 : i32, i32
  }
}

</mosaic_0001>

<bundles_post_ra>
// kernel: tile.33
= control target key start
LH: loop header
LB: loop body
LE: loop exit
PB: predicated region body
PF: predicated region fallthrough
CT: control target
= control target key end

     0   :  { %s28_s0 = inlined_call_operand.vmem [shape: f32[8], index: 0, kind: input, shape index: {}]   ;;  %s29_s1 = inlined_call_operand.vmem [shape: f32[16,8], index: 1, kind: output, shape index: {}]  }
   0x1   :  { %v4_v0 = vld [vmem:[%s28_s0] ss:$0 sm:$0xff] }
   0x2   :  { %5 = vst [vmem:[%s29_s1] sm:$0xff] %v4_v0  ;;  %8 = vst [vmem:[%s29_s1 + $0x8] sm:$0xff] %v4_v0 }

// kernel: tile.46
= control target key start
LH: loop header
LB: loop body
LE: loop exit
PB: predicated region body
PF: predicated region fallthrough
CT: control target
= control target key end

     0   :  { %s133_s10 = smov 120   ;;  %s134_s11 = smov 104   ;;  %vm3_vm0 = vcmask 64512   ;;  %vm9_vm1 = vcmask 1048512   ;;  %vm15_vm2 = vcmask 982912   ;;  %vm21_vm3 = vcmask 917312   ;;  %s209_s0 = inlined_call_operand.vmem [shape: f32[16,8], index: 0, kind: input, shape index: {}]   ;;  %s210_s1 = inlined_call_operand.vmem [shape: f32[1,128], index: 1, kind: output, shape index: {}]  }
   0x1   :  { %v103_v0 = vld [vmem:[%s209_s0 + $0xf] sm:$0x1]   ;;  %v105_v1 = vld [vmem:[%s209_s0 + $0xd] sm:$0x1]   ;;  %v104_v2 = vld [vmem:[%s209_s0 + $0xe] sm:$0x1]  }
   0x2   :  { %7 = vrot.lane.b32.xlu0 %v103_v0, %s133_s10  ;;  %19 = vrot.lane.b32.xlu1 %v105_v1, %s134_s11  ;;  %v106_v3 = vld [vmem:[%s209_s0 + $0xc] sm:$0x1]   ;;  %s135_s16 = smov 112   ;;  %s136_s17 = smov 96   ;;  %v107_v4 = vld [vmem:[%s209_s0 + $0xb] sm:$0x1]  }
   0x3   :  { %v108_v5 = vld [vmem:[%s209_s0 + $0xa] sm:$0x1]   ;;  %v2_v6 = vld [vmem:[%s209_s0] sm:$0x1]   ;;  %s137_s24 = smov 88   ;;  %s138_s25 = smov 80  }
   0x4   :  { %4 = vst.msk [vmem:[#allocation0] sm:$0x1] %vm3_vm0, %v2_v6   ;;  %v109_v7 = vld [vmem:[%s209_s0 + $0x9] sm:$0x1]   ;;  %v110_v8 = vld [vmem:[%s209_s0 + $0x8] sm:$0x1]  }
   0x5   :  { %s139_s30 = smov 72   ;;  %s140_s2 = smov 64   ;;  %v111_v9 = vld [vmem:[%s209_s0 + $0x7] sm:$0x1]   ;;  %v112_v10 = vld [vmem:[%s209_s0 + $0x6] sm:$0x1]  }
   0x6   :  { %13 = vrot.lane.b32.xlu0 %v104_v2, %s135_s16  ;;  %25 = vrot.lane.b32.xlu1 %v106_v3, %s136_s17  ;;  %s141_s7 = smov 56   ;;  %s142_s8 = smov 48   ;;  %v113_v11 = vld [vmem:[%s209_s0 + $0x5] sm:$0x1]   ;;  %v114_v12 = vld [vmem:[%s209_s0 + $0x4] sm:$0x1]  }
   0x7   :  { %s143_s13 = smov 40   ;;  %s144_s14 = smov 32   ;;  %v115_v13 = vld [vmem:[%s209_s0 + $0x3] sm:$0x1]   ;;  %v116_v14 = vld [vmem:[%s209_s0 + $0x2] sm:$0x1]  }
   0x8   :  { %s145_s19 = smov 24   ;;  %s146_s20 = smov 16   ;;  %v117_v15 = vld [vmem:[%s209_s0 + $0x1] sm:$0x1]   ;;  %vm27_vm4 = vcmask 851712   ;;  %vm33_vm5 = vcmask 786112  }
   0x9   :  { %s147_s0 = smov 8   ;;  %vm39_vm6 = vcmask 720512   ;;  %vm45_vm7 = vcmask 654912   ;;  %vm51_vm8 = vcmask 589312   ;;  %vm57_vm9 = vcmask 523712  }
   0xa   :  { %31 = vrot.lane.b32.xlu0 %v107_v4, %s137_s24  ;;  %37 = vrot.lane.b32.xlu1 %v108_v5, %s138_s25  ;;  %vm63_vm10 = vcmask 458112   ;;  %vm69_vm11 = vcmask 392512   ;;  %vm75_vm12 = vcmask 326912   ;;  %vm81_vm13 = vcmask 261312  }
   0xb   :  { %vm87_vm14 = vcmask 195712   ;;  %vm93_vm15 = vcmask 130112  }
   0xe   :  { %43 = vrot.lane.b32.xlu0 %v109_v7, %s139_s30  ;;  %49 = vrot.lane.b32.xlu1 %v110_v8, %s140_s2 }
  0x12   :  { %55 = vrot.lane.b32.xlu0 %v111_v9, %s141_s7  ;;  %61 = vrot.lane.b32.xlu1 %v112_v10, %s142_s8 }
  0x16   :  { %67 = vrot.lane.b32.xlu0 %v113_v11, %s143_s13  ;;  %73 = vrot.lane.b32.xlu1 %v114_v12, %s144_s14 }
  0x1a   :  { %79 = vrot.lane.b32.xlu0 %v115_v13, %s145_s19  ;;  %85 = vrot.lane.b32.xlu1 %v116_v14, %s146_s20 }
  0x1e   :  { %91 = vrot.lane.b32.xlu0 %v117_v15, %s147_s0 }
  0x74   :  { %v8_v16 = vpop.permute.xlu0 %7   ;;  %v20_v17 = vpop.permute.xlu1 %19  }
  0x75   :  { %10 = vst.msk [vmem:[#allocation0] sm:$0x1] %vm9_vm1, %v8_v16  }
  0x78   :  { %v14_v18 = vpop.permute.xlu0 %13   ;;  %v26_v19 = vpop.permute.xlu1 %25  }
  0x79   :  { %16 = vst.msk [vmem:[#allocation0] sm:$0x1] %vm15_vm2, %v14_v18  }
  0x7a   :  { %22 = vst.msk [vmem:[#allocation0] sm:$0x1] %vm21_vm3, %v20_v17  }
  0x7b   :  { %28 = vst.msk [vmem:[#allocation0] sm:$0x1] %vm27_vm4, %v26_v19  }
  0x7c   :  { %v32_v20 = vpop.permute.xlu0 %31   ;;  %v38_v21 = vpop.permute.xlu1 %37  }
  0x7d   :  { %34 = vst.msk [vmem:[#allocation0] sm:$0x1] %vm33_vm5, %v32_v20  }
  0x7e   :  { %40 = vst.msk [vmem:[#allocation0] sm:$0x1] %vm39_vm6, %v38_v21  }
  0x80   :  { %v44_v22 = vpop.permute.xlu0 %43   ;;  %v50_v23 = vpop.permute.xlu1 %49  }
  0x81   :  { %46 = vst.msk [vmem:[#allocation0] sm:$0x1] %vm45_vm7, %v44_v22  }
  0x82   :  { %52 = vst.msk [vmem:[#allocation0] sm:$0x1] %vm51_vm8, %v50_v23  }
  0x84   :  { %v56_v24 = vpop.permute.xlu0 %55   ;;  %v62_v25 = vpop.permute.xlu1 %61  }
  0x85   :  { %58 = vst.msk [vmem:[#allocation0] sm:$0x1] %vm57_vm9, %v56_v24  }
  0x86   :  { %64 = vst.msk [vmem:[#allocation0] sm:$0x1] %vm63_vm10, %v62_v25  }
  0x88   :  { %v68_v26 = vpop.permute.xlu0 %67   ;;  %v74_v27 = vpop.permute.xlu1 %73  }
  0x89   :  { %70 = vst.msk [vmem:[#allocation0] sm:$0x1] %vm69_vm11, %v68_v26  }
  0x8a   :  { %76 = vst.msk [vmem:[#allocation0] sm:$0x1] %vm75_vm12, %v74_v27  }
  0x8c   :  { %v80_v28 = vpop.permute.xlu0 %79   ;;  %v86_v29 = vpop.permute.xlu1 %85  }
  0x8d   :  { %82 = vst.msk [vmem:[#allocation0] sm:$0x1] %vm81_vm13, %v80_v28  }
  0x8e   :  { %88 = vst.msk [vmem:[#allocation0] sm:$0x1] %vm87_vm14, %v86_v29  }
  0x90   :  { %v92_v30 = vpop.permute.xlu0 %91  }
  0x91   :  { %94 = vst.msk [vmem:[#allocation0] sm:$0x1] %vm93_vm15, %v92_v30  }
  0x98   :  { %v99_v31 = vld [vmem:[#allocation0] sm:$0x1] }
  0x99   :  { %102 = vst [vmem:[%s210_s1] sm:$0x1] %v99_v31 }

// kernel: double_conv_forward.1
= control target key start
LH: loop header
LB: loop body
LE: loop exit
PB: predicated region body
PF: predicated region fallthrough
CT: control target
= control target key end

     0   :  { %vm23_vm0 = vcmask 516096   ;;  %v1611_v3 = vmov 0.0   ;;  %vm32_vm1 = vcmask 523264   ;;  %vm1612_vm2 = vmmov 0   ;;  %s2121_s1 = inlined_call_operand.vmem [shape: f32[3,64,128], index: 1, kind: input, shape index: {}]   ;;  %s2122_s0 = inlined_call_operand.vmem [shape: f32[2,16,64], index: 0, kind: input, shape index: {}]   ;;  %s2123_s5 = inlined_call_operand.vmem [shape: f32[128,8], index: 5, kind: input, shape index: {}]   ;;  %s2124_s4 = inlined_call_operand.vmem [shape: f32[8,128], index: 4, kind: input, shape index: {}]   ;;  %s2125_s2 = inlined_call_operand.vmem [shape: f32[3,128,128], index: 2, kind: input, shape index: {}]   ;;  %s2126_s3 = inlined_call_operand.vmem [shape: f32[4,128], index: 3, kind: input, shape index: {}]   ;;  %s2127_s6 = inlined_call_operand.vmem [shape: f32[32,128], index: 6, kind: output, shape index: {}]  }
   0x1   :  { %v1156_v0 = vld [vmem:[%s2121_s1 + $0x78] sm:$0xff]  ;;  %v1155_v2 = vld [vmem:[%s2121_s1 + $0x70] sm:$0xff]  ;;  %24 = vst.msk [vmem:[#allocation2] sm:$0x1] %vm23_vm0, %v1611_v3  ;;  %25 = vst.msk [vmem:[#allocation2 + $0x18] sm:$0x1] %vm23_vm0, %v1611_v3 }
   0x2   :  { %v58_v1 = vld [vmem:[%s2121_s1 + $0x38] sm:$0xff]  ;;  %26 = vst.msk [vmem:[#allocation2 + $0x11] sm:$0x1] %vm23_vm0, %v1611_v3  ;;  %27 = vst.msk [vmem:[#allocation2 + $0x29] sm:$0x1] %vm23_vm0, %v1611_v3  ;;  %1345 = vmatprep.subr.mxu0 %v1156_v0  ;;  %v57_v4 = vld [vmem:[%s2121_s1 + $0x30] sm:$0xff] }
   0x3   :  { %592 = vst [vmem:[#allocation3] sm:$0x1] %v1611_v3  ;;  %593 = vst [vmem:[#allocation3 + $0x18] sm:$0x1] %v1611_v3  ;;  %1367 = vmatprep.subr.mxu1 %v58_v1  ;;  %1346 = vmatpush3.msra.mxu0 %v1156_v0  ;;  %v1154_v5 = vld [vmem:[%s2121_s1 + $0x68] sm:$0xff]  ;;  %v1153_v7 = vld [vmem:[%s2121_s1 + $0x60] sm:$0xff] }
   0x4   :  { %594 = vst [vmem:[#allocation3 + $0x11] sm:$0x1] %v1611_v3  ;;  %595 = vst [vmem:[#allocation3 + $0x29] sm:$0x1] %v1611_v3  ;;  %1368 = vmatpush3.msra.mxu1 %v58_v1  ;;  %v56_v6 = vld [vmem:[%s2121_s1 + $0x28] sm:$0xff]  ;;  %1347 = vmatprep.subr.mxu0 %v1155_v2  ;;  %v55_v8 = vld [vmem:[%s2121_s1 + $0x20] sm:$0xff] }
   0x5   :  { %1369 = vmatprep.subr.mxu1 %v57_v4  ;;  %1348 = vmatpush3.msra.mxu0 %v1155_v2  ;;  %v28_v9 = vld [vmem:[%s2122_s0] sm:$0xff]  ;;  %v29_v10 = vld [vmem:[%s2122_s0 + $0x8] sm:$0xff]  ;;  %v1152_v11 = vld [vmem:[%s2121_s1 + $0x58] sm:$0xff]  ;;  %vm394_vm3 = vcmask 1040384   ;;  %vm492_vm4 = vcmask 64512  }
   0x6   :  { %1370 = vmatpush3.msra.mxu1 %v57_v4  ;;  %1349 = vmatprep.subr.mxu0 %v1154_v5  ;;  %v54_v12 = vld [vmem:[%s2121_s1 + $0x18] sm:$0xff]  ;;  %33 = vst.msk [vmem:[#allocation2 + $0x1] sm:$0xff] %vm32_vm1, %v28_v9  ;;  %34 = vst.msk [vmem:[#allocation2 + $0x9] sm:$0xff] %vm32_vm1, %v29_v10  ;;  %v30_v13 = vld [vmem:[%s2122_s0 + $0x10] sm:$0xff] }
   0x7   :  { %1371 = vmatprep.subr.mxu1 %v56_v6  ;;  %1350 = vmatpush3.msra.mxu0 %v1154_v5  ;;  %v1151_v14 = vld [vmem:[%s2121_s1 + $0x50] sm:$0xff]  ;;  %35 = vst.msk [vmem:[#allocation2 + $0x19] sm:$0xff] %vm32_vm1, %v30_v13  ;;  %v31_v16 = vld [vmem:[%s2122_s0 + $0x18] sm:$0xff]  ;;  %v1150_v17 = vld [vmem:[%s2121_s1 + $0x48] sm:$0xff] }
   0x8   :  { %1372 = vmatpush3.msra.mxu1 %v56_v6  ;;  %1351 = vmatprep.subr.mxu0 %v1153_v7  ;;  %v53_v15 = vld [vmem:[%s2121_s1 + $0x10] sm:$0xff]  ;;  %36 = vst.msk [vmem:[#allocation2 + $0x21] sm:$0xff] %vm32_vm1, %v31_v16  ;;  %v52_v18 = vld [vmem:[%s2121_s1 + $0x8] sm:$0xff]  ;;  %v1149_v19 = vld [vmem:[%s2121_s1 + $0x40] sm:$0xff] }
   0x9   :  { %1373 = vmatprep.subr.mxu1 %v55_v8  ;;  %1352 = vmatpush3.msra.mxu0 %v1153_v7  ;;  %v51_v20 = vld [vmem:[%s2121_s1] sm:$0xff]  ;;  %v1172_v25 = vld [vmem:[%s2121_s1 + $0xb8] sm:$0xff]  ;;  %v1171_v28 = vld [vmem:[%s2121_s1 + $0xb0] sm:$0xff] }
   0xa   :  { %1374 = vmatpush3.msra.mxu1 %v55_v8  ;;  %1353 = vmatprep.subr.mxu0 %v1152_v11  ;;  %v1170_v30 = vld [vmem:[%s2121_s1 + $0xa8] sm:$0xff]  ;;  %v1169_v33 = vld [vmem:[%s2121_s1 + $0xa0] sm:$0xff]  ;;  %v1168_v34 = vld [vmem:[%s2121_s1 + $0x98] sm:$0xff] }
   0xb   :  { %1375 = vmatprep.subr.mxu1 %v54_v12  ;;  %1354 = vmatpush3.msra.mxu0 %v1152_v11  ;;  %v1167_v35 = vld [vmem:[%s2121_s1 + $0x90] sm:$0xff]  ;;  %v1166_v36 = vld [vmem:[%s2121_s1 + $0x88] sm:$0xff]  ;;  %v1165_v37 = vld [vmem:[%s2121_s1 + $0x80] sm:$0xff] }
   0xc   :  { %1376 = vmatpush3.msra.mxu1 %v54_v12  ;;  %1355 = vmatprep.subr.mxu0 %v1151_v14  ;;  %v1761_v41 = vld [vmem:[%s2123_s5 + $0x78] sm:$0xff]  ;;  %v1766_v42 = vld [vmem:[%s2123_s5 + $0x70] sm:$0xff]  ;;  %v1775_v43 = vld [vmem:[%s2123_s5 + $0x68] sm:$0xff] }
   0xd   :  { %1377 = vmatprep.subr.mxu1 %v53_v15  ;;  %1356 = vmatpush3.msra.mxu0 %v1151_v14  ;;  %v43_v21 = vld [vmem:[#allocation2 + $0x1] sm:$0xff]  ;;  %v44_v23 = vld [vmem:[#allocation2 + $0x9] sm:$0xff]  ;;  %v1789_v45 = vld [vmem:[%s2123_s5 + $0x58] sm:$0xff] }
   0xe   :  { %1378 = vmatpush3.msra.mxu1 %v53_v15  ;;  %1357 = vmatprep.subr.mxu0 %v1150_v17  ;;  %v39_v22 = vld [vmem:[#allocation2] sm:$0xff]  ;;  %v40_v24 = vld [vmem:[#allocation2 + $0x8] sm:$0xff]  ;;  %v41_v27 = vld [vmem:[#allocation2 + $0x18] sm:$0xff] }
   0xf   :  { %1379 = vmatprep.subr.mxu1 %v52_v18  ;;  %1358 = vmatpush3.msra.mxu0 %v1150_v17  ;;  %v45_v26 = vld [vmem:[#allocation2 + $0x19] sm:$0xff]  ;;  %v46_v31 = vld [vmem:[#allocation2 + $0x21] sm:$0xff]  ;;  %v48_v38 = vld [vmem:[#allocation2 + $0xa] sm:$0xff] }
  0x10   :  { %1380 = vmatpush3.msra.mxu1 %v52_v18  ;;  %1359 = vmatprep.subr.mxu0 %v1149_v19  ;;  %v42_v29 = vld [vmem:[#allocation2 + $0x20] sm:$0xff]  ;;  %v1796_v46 = vld [vmem:[%s2123_s5 + $0x50] sm:$0xff]  ;;  %v1803_v47 = vld [vmem:[%s2123_s5 + $0x48] sm:$0xff] }
  0x11   :  { %1381 = vmatprep.subr.mxu1 %v51_v20  ;;  %1360 = vmatpush3.msra.mxu0 %v1149_v19  ;;  %v47_v32 = vld [vmem:[#allocation2 + $0x2] sm:$0xff]  ;;  %v49_v39 = vld [vmem:[#allocation2 + $0x1a] sm:$0xff]  ;;  %v1824_v50 = vld [vmem:[%s2123_s5 + $0x30] sm:$0xff] }
  0x12   :  { %1361 = vmatprep.mubr.msk.f32.mxu0 %vm32_vm1, %v43_v21  ;;  %1382 = vmatpush3.msra.mxu1 %v51_v20  ;;  %v50_v40 = vld [vmem:[#allocation2 + $0x22] sm:$0xff]  ;;  %v1817_v49 = vld [vmem:[%s2123_s5 + $0x38] sm:$0xff]  ;;  %v1850_v54 = vld [vmem:[%s2123_s5 + $0x10] sm:$0xff] }
  0x13   :  { %1383 = vmatprep.mubr.msk.f32.mxu1 %vm32_vm1, %v39_v22  ;;  %1362 = vmatmul.mubr.msk.f32.vlgmr.msra.gmra.mxu0 %vm32_vm1, %v44_v23  ;;  %v1782_v44 = vld [vmem:[%s2123_s5 + $0x60] sm:$0xff]  ;;  %v1831_v51 = vld [vmem:[%s2123_s5 + $0x28] sm:$0xff]  ;;  %v1844_v53 = vld [vmem:[%s2123_s5 + $0x18] sm:$0xff] }
  0x14   :  { %1384 = vmatmul.mubr.msk.f32.vlgmr.msra.gmra.mxu1 %vm32_vm1, %v40_v24  ;;  %1389 = vmatprep.subr.mxu0 %v1172_v25  ;;  %v1810_v48 = vld [vmem:[%s2123_s5 + $0x40] sm:$0xff]  ;;  %v1861_v55 = vld [vmem:[%s2123_s5 + $0x8] sm:$0xff] }
  0x15   :  { %1364 = vmatprep.mubr.msk.f32.mxu0 %vm32_vm1, %v45_v26  ;;  %1390 = vmatpush3.msra.mxu0 %v1172_v25  ;;  %v1838_v52 = vld [vmem:[%s2123_s5 + $0x20] sm:$0xff] }
  0x16   :  { %1386 = vmatprep.mubr.msk.f32.mxu1 %vm32_vm1, %v41_v27  ;;  %1391 = vmatprep.subr.mxu0 %v1171_v28  ;;  %v1868_v56 = vld [vmem:[%s2123_s5] sm:$0xff] }
  0x17   :  { %1411 = vmatprep.subr.mxu1 %v1611_v3  ;;  %1392 = vmatpush3.msra.mxu0 %v1171_v28 }
  0x18   :  { %1387 = vmatmul.mubr.msk.f32.gmra.mxu1 %vm32_vm1, %v42_v29  ;;  %1393 = vmatprep.subr.mxu0 %v1170_v30 }
  0x19   :  { %1365 = vmatmul.mubr.msk.f32.gmra.mxu0 %vm32_vm1, %v46_v31  ;;  %1412 = vmatpush3.msra.mxu1 %v1761_v41 }
  0x1a   :  { %1394 = vmatpush3.msra.mxu0 %v1170_v30  ;;  %1405 = vmatprep.mubr.msk.f32.mxu0 %vm32_vm1, %v47_v32 }
  0x1b   :  { %1395 = vmatprep.subr.mxu0 %v1169_v33  ;;  %1413 = vmatprep.subr.mxu1 %v1611_v3 }
  0x1c   :  { %1396 = vmatpush3.msra.mxu0 %v1169_v33  ;;  %1414 = vmatpush3.msra.mxu1 %v1766_v42 }
  0x1d   :  { %1397 = vmatprep.subr.mxu0 %v1168_v34  ;;  %1415 = vmatprep.subr.mxu1 %v1611_v3 }
  0x1e   :  { %1398 = vmatpush3.msra.mxu0 %v1168_v34  ;;  %1416 = vmatpush3.msra.mxu1 %v1775_v43 }
  0x1f   :  { %1399 = vmatprep.subr.mxu0 %v1167_v35  ;;  %1417 = vmatprep.subr.mxu1 %v1611_v3 }
  0x20   :  { %1400 = vmatpush3.msra.mxu0 %v1167_v35  ;;  %1418 = vmatpush3.msra.mxu1 %v1782_v44 }
  0x21   :  { %1401 = vmatprep.subr.mxu0 %v1166_v36  ;;  %1419 = vmatprep.subr.mxu1 %v1611_v3 }
  0x22   :  { %1402 = vmatpush3.msra.mxu0 %v1166_v36  ;;  %1420 = vmatpush3.msra.mxu1 %v1789_v45 }
  0x23   :  { %1403 = vmatprep.subr.mxu0 %v1165_v37  ;;  %1421 = vmatprep.subr.mxu1 %v1611_v3 }
  0x24   :  { %1404 = vmatpush3.msra.mxu0 %v1165_v37  ;;  %1422 = vmatpush3.msra.mxu1 %v1796_v46  ;;  %v1897_v37 = vld [vmem:[%s2124_s4] sm:$0xff] }
  0x25   :  { %1406 = vmatmul.mubr.msk.f32.vlgmr.msra.gmra.mxu0 %vm32_vm1, %v48_v38  ;;  %1446 = vmatprep.subr.mxu0 %v1611_v3  ;;  %v1193_v38 = vld [vmem:[%s2125_s2 + $0xf8] sm:$0xff] }
  0x26   :  { %1408 = vmatprep.mubr.msk.f32.mxu0 %vm32_vm1, %v49_v39  ;;  %1423 = vmatprep.subr.mxu1 %v1611_v3  ;;  %v629_v39 = vld [vmem:[%s2125_s2 + $0x78] sm:$0xff] }
  0x27   :  { %1424 = vmatpush3.msra.mxu1 %v1803_v47  ;;  %1443 = vmatprep.mubr.msk.f32.mxu1 %vm1612_vm2, %v1611_v3 }
  0x28   :  { %1425 = vmatprep.subr.mxu1 %v1611_v3  ;;  %1447 = vmatpush3.msra.mxu0 %v1897_v37 }
  0x29   :  { %1409 = vmatmul.mubr.msk.f32.gmra.mxu0 %vm32_vm1, %v50_v40  ;;  %1426 = vmatpush3.msra.mxu1 %v1810_v48  ;;  %v628_v40 = vld [vmem:[%s2125_s2 + $0x70] sm:$0xff] }
  0x2a   :  { %1427 = vmatprep.subr.mxu1 %v1611_v3  ;;  %1448 = vmatprep.mubr.msk.f32.mxu0 %vm1612_vm2, %v1611_v3 }
  0x2b   :  { %1428 = vmatpush3.msra.mxu1 %v1817_v49  ;;  %1451 = vmatprep.subr.mxu0 %v1193_v38 }
  0x2c   :  { %1429 = vmatprep.subr.mxu1 %v1611_v3 }
  0x2d   :  { %1430 = vmatpush3.msra.mxu1 %v1824_v50 }
  0x2e   :  { %1431 = vmatprep.subr.mxu1 %v1611_v3 }
  0x2f   :  { %1432 = vmatpush3.msra.mxu1 %v1831_v51 }
  0x30   :  { %1433 = vmatprep.subr.mxu1 %v1611_v3 }
  0x31   :  { %1434 = vmatpush3.msra.mxu1 %v1838_v52 }
  0x32   :  { %1435 = vmatprep.subr.mxu1 %v1611_v3 }
  0x33   :  { %1436 = vmatpush3.msra.mxu1 %v1844_v53 }
  0x34   :  { %1437 = vmatprep.subr.mxu1 %v1611_v3 }
  0x35   :  { %1438 = vmatpush3.msra.mxu1 %v1850_v54 }
  0x36   :  { %1439 = vmatprep.subr.mxu1 %v1611_v3 }
  0x37   :  { %1440 = vmatpush3.msra.mxu1 %v1861_v55 }
  0x38   :  { %1441 = vmatprep.subr.mxu1 %v1611_v3 }
  0x39   :  { %1442 = vmatpush3.msra.mxu1 %v1868_v56 }
  0x3a   :  { %1489 = vmatprep.subr.mxu1 %v629_v39 }
  0xd3   :  { %v1363_v57 = vpop.f32.mrf.mxu0 }
  0xd4   :  { %v1385_v58 = vpop.f32.mrf.mxu1 }
  0xd5   :  { %v146_v59 = vpop.f32.mrf.mxu0  ;;  %v249_v1 = vadd.f32 %v1385_v58, %v1363_v57  ;;  %v627_v57 = vld [vmem:[%s2125_s2 + $0x68] sm:$0xff]  ;;  %v626_v58 = vld [vmem:[%s2125_s2 + $0x60] sm:$0xff] }
  0xd6   :  { %v243_v61 = vpop.f32.mrf.mxu1 }
  0xd7   :  { %v244_v2 = vadd.f32 %v243_v61, %v146_v59 }
  0xd8   :  { %v1388_v62 = vpop.f32.mrf.mxu1 }
  0xd9   :  { %v1366_v60 = vpop.f32.mrf.mxu0 }
  0xda   :  { %v253_v4 = vpop.f32.mrf.mxu1  ;;  %v259_v9 = vadd.f32 %v1388_v62, %v1366_v60 }
  0xdb   :  { %v156_v63 = vpop.f32.mrf.mxu0 }
  0xdc   :  { %v254_v10 = vadd.f32 %v253_v4, %v156_v63 }
  0xe5   :  { %v1407_v0 = vpop.f32.mrf.mxu0 }
  0xe6   :  { %v1873_v6 = vadd.f32 %v1407_v0, %v249_v1 }
  0xe7   :  { %v349_v5 = vpop.f32.mrf.mxu0 }
  0xe8   :  { %v1875_v7 = vadd.f32 %v349_v5, %v244_v2  ;;  %v382_v13 = vmul.f32 %v1873_v6, %v1873_v6  ;;  %v1192_v5 = vld [vmem:[%s2125_s2 + $0xf0] sm:$0xff] }
  0xe9   :  { %v1410_v8 = vpop.f32.mrf.mxu0 }
  0xea   :  { %v381_v11 = vmul.f32 %v1875_v7, %v1875_v7  ;;  %v372_v14 = vadd.f32 %v1873_v6, %v1875_v7  ;;  %v1883_v15 = vadd.f32 %v1410_v8, %v259_v9  ;;  %v1191_v8 = vld [vmem:[%s2125_s2 + $0xe8] sm:$0xff]  ;;  %v1190_v9 = vld [vmem:[%s2125_s2 + $0xe0] sm:$0xff] }
  0xeb   :  { %v359_v12 = vpop.f32.mrf.mxu0 }
  0xec   :  { %v1885_v16 = vadd.f32 %v359_v12, %v254_v10  ;;  %v385_v17 = vadd.f32 %v382_v13, %v381_v11  ;;  %v384_v20 = vmul.f32 %v1883_v15, %v1883_v15  ;;  %v1189_v10 = vld [vmem:[%s2125_s2 + $0xd8] sm:$0xff]  ;;  %v1188_v11 = vld [vmem:[%s2125_s2 + $0xd0] sm:$0xff]  ;;  %v1187_v12 = vld [vmem:[%s2125_s2 + $0xc8] sm:$0xff] }
  0xed   :  { %v1186_v13 = vld [vmem:[%s2125_s2 + $0xc0] sm:$0xff] }
  0xee   :  { %v373_v18 = vadd.f32 %v372_v14, %v1885_v16  ;;  %v383_v19 = vmul.f32 %v1885_v16, %v1885_v16  ;;  %v1185_v14 = vld [vmem:[%s2125_s2 + $0xb8] sm:$0xff] }
  0xf0   :  { %v374_v21 = vadd.f32 %v373_v18, %v1883_v15  ;;  %v386_v22 = vadd.f32 %v385_v17, %v383_v19  ;;  %v625_v17 = vld [vmem:[%s2125_s2 + $0x58] sm:$0xff]  ;;  %v1184_v18 = vld [vmem:[%s2125_s2 + $0xb0] sm:$0xff] }
  0xf1   :  { %v624_v19 = vld [vmem:[%s2125_s2 + $0x50] sm:$0xff] }
  0xf2   :  { %v375_v23 = vrot.slane %v374_v21, 4  ;;  %v387_v24 = vadd.f32 %v386_v22, %v384_v20  ;;  %v1183_v20 = vld [vmem:[%s2125_s2 + $0xa8] sm:$0xff]  ;;  %v1182_v22 = vld [vmem:[%s2125_s2 + $0xa0] sm:$0xff] }
  0xf4   :  { %v376_v25 = vadd.f32 %v375_v23, %v374_v21  ;;  %v388_v26 = vrot.slane %v387_v24, 4  ;;  %v623_v21 = vld [vmem:[%s2125_s2 + $0x48] sm:$0xff]  ;;  %v622_v23 = vld [vmem:[%s2125_s2 + $0x40] sm:$0xff] }
  0xf6   :  { %v377_v27 = vrot.slane %v376_v25, 2  ;;  %v389_v28 = vadd.f32 %v388_v26, %v387_v24  ;;  %v1181_v24 = vld [vmem:[%s2125_s2 + $0x98] sm:$0xff]  ;;  %v1180_v26 = vld [vmem:[%s2125_s2 + $0x90] sm:$0xff] }
  0xf8   :  { %v378_v29 = vadd.f32 %v377_v27, %v376_v25  ;;  %v390_v30 = vrot.slane %v389_v28, 2  ;;  %v621_v25 = vld [vmem:[%s2125_s2 + $0x38] sm:$0xff]  ;;  %v620_v27 = vld [vmem:[%s2125_s2 + $0x30] sm:$0xff] }
  0xfa   :  { %v379_v31 = vrot.slane %v378_v29, 1  ;;  %v391_v32 = vadd.f32 %v390_v30, %v389_v28  ;;  %v1179_v28 = vld [vmem:[%s2125_s2 + $0x88] sm:$0xff]  ;;  %v1178_v30 = vld [vmem:[%s2125_s2 + $0x80] sm:$0xff] }
  0xfc   :  { %v392_v33 = vrot.slane %v391_v32, 1  ;;  %v380_v34 = vadd.f32 %v379_v31, %v378_v29  ;;  %v619_v29 = vld [vmem:[%s2125_s2 + $0x28] sm:$0xff]  ;;  %v618_v31 = vld [vmem:[%s2125_s2 + $0x20] sm:$0xff] }
  0xfe   :  { %v393_v35 = vadd.f32 %v392_v33, %v391_v32  ;;  %v617_v32 = vld [vmem:[%s2125_s2 + $0x18] sm:$0xff]  ;;  %v616_v33 = vld [vmem:[%s2125_s2 + $0x10] sm:$0xff] }
 0x100   :  { %v395_v36 = vsel %vm394_vm3, %v380_v34, %v393_v35  ;;  %v1209_v34 = vld [vmem:[%s2125_s2 + $0x178] sm:$0xff]  ;;  %v615_v35 = vld [vmem:[%s2125_s2 + $0x8] sm:$0xff] }
 0x101   :  { %1444 = vmatmul.mubr.f32.vlgmr.msra.gmra.mxu1 %v395_v36  ;;  %v614_v36 = vld [vmem:[%s2125_s2] sm:$0xff] }
 0x102   :  { %1490 = vmatpush3.msra.mxu1 %v629_v39 }
 0x103   :  { %1491 = vmatprep.subr.mxu1 %v628_v40 }
 0x104   :  { %1492 = vmatpush3.msra.mxu1 %v628_v40  ;;  %v37_v40 = vld [vmem:[%s2126_s3] sm:$0x1] }
 0x105   :  { %1493 = vmatprep.subr.mxu1 %v627_v57 }
 0x106   :  { %1494 = vmatpush3.msra.mxu1 %v627_v57 }
 0x107   :  { %1495 = vmatprep.subr.mxu1 %v626_v58 }
 0x108   :  { %1496 = vmatpush3.msra.mxu1 %v626_v58 }
 0x109   :  { %1497 = vmatprep.subr.mxu1 %v625_v17 }
 0x10a   :  { %1498 = vmatpush3.msra.mxu1 %v625_v17 }
 0x10b   :  { %1499 = vmatprep.subr.mxu1 %v624_v19 }
 0x10c   :  { %1500 = vmatpush3.msra.mxu1 %v624_v19 }
 0x10d   :  { %1501 = vmatprep.subr.mxu1 %v623_v21 }
 0x10e   :  { %1502 = vmatpush3.msra.mxu1 %v623_v21  ;;  %v1205_v21 = vld [vmem:[%s2125_s2 + $0x158] sm:$0xff] }
 0x10f   :  { %1503 = vmatprep.subr.mxu1 %v622_v23 }
 0x110   :  { %1504 = vmatpush3.msra.mxu1 %v622_v23 }
 0x111   :  { %1505 = vmatprep.subr.mxu1 %v621_v25 }
 0x112   :  { %1506 = vmatpush3.msra.mxu1 %v621_v25  ;;  %v1203_v25 = vld [vmem:[%s2125_s2 + $0x148] sm:$0xff] }
 0x113   :  { %1507 = vmatprep.subr.mxu1 %v620_v27 }
 0x114   :  { %1508 = vmatpush3.msra.mxu1 %v620_v27  ;;  %v1202_v27 = vld [vmem:[%s2125_s2 + $0x140] sm:$0xff] }
 0x115   :  { %1509 = vmatprep.subr.mxu1 %v619_v29 }
 0x116   :  { %1510 = vmatpush3.msra.mxu1 %v619_v29 }
 0x117   :  { %1511 = vmatprep.subr.mxu1 %v618_v31 }
 0x118   :  { %1512 = vmatpush3.msra.mxu1 %v618_v31 }
 0x119   :  { %1513 = vmatprep.subr.mxu1 %v617_v32 }
 0x11a   :  { %1514 = vmatpush3.msra.mxu1 %v617_v32 }
 0x11b   :  { %1515 = vmatprep.subr.mxu1 %v616_v33 }
 0x11c   :  { %1516 = vmatpush3.msra.mxu1 %v616_v33 }
 0x11d   :  { %1517 = vmatprep.subr.mxu1 %v615_v35 }
 0x11e   :  { %1518 = vmatpush3.msra.mxu1 %v615_v35 }
 0x11f   :  { %1519 = vmatprep.subr.mxu1 %v614_v36 }
 0x120   :  { %1520 = vmatpush3.msra.mxu1 %v614_v36 }
 0x121   :  { %1565 = vmatprep.subr.mxu1 %v1611_v3 }
 0x1c1   :  { %v478_v59 = vpop.f32.mrf.mxu1 }
 0x1c2   :  { %v482_v60 = vmul.f32 0.001953125, %v478_v59 }
 0x1c3   :  { %v1445_v61 = vpop.f32.mrf.mxu1 }
 0x1c4   :  { %v483_v62 = vmul.f32 %v482_v60, %v482_v60 }
 0x1c6   :  { %v485_v63 = vrot.slane %v483_v62, 7  ;;  %v38_v62 = vld [vmem:[%s2126_s3 + $0x1] sm:$0x1] }
 0x1c8   :  { %v487_v0 = vsub.f32 %v482_v60, %v485_v63 }
 0x1ca   :  { %v488_v1 = vadd.f32 1e-05, %v487_v0 }
 0x1cc   :  { %1607 = vrsqrt.f32 %v488_v1 }
 0x1d9   :  { %v1608_v2 = vpop.eup %1607 }
 0x1da   :  { %v490_v4 = vsel %vm394_vm3, %v482_v60, %v1608_v2 }
 0x1db   :  { %1449 = vmatmul.mubr.msk.f32.vlgmr.msra.gmra.mxu0 %vm492_vm4, %v490_v4 }
 0x1dc   :  { %1452 = vmatpush3.msra.mxu0 %v1193_v38  ;;  %v572_v38 = vlaneseq }
 0x1dd   :  { %1453 = vmatprep.subr.mxu0 %v1192_v5 }
 0x1de   :  { %1454 = vmatpush3.msra.mxu0 %v1192_v5  ;;  %v573_v39 = vshrl.u32 %v572_v38, 7 }
 0x1df   :  { %1455 = vmatprep.subr.mxu0 %v1191_v8 }
 0x1e0   :  { %1456 = vmatpush3.msra.mxu0 %v1191_v8  ;;  %v2005_v59 = vsub.s32 0, %v573_v39 }
 0x1e1   :  { %1457 = vmatprep.subr.mxu0 %v1190_v9 }
 0x1e2   :  { %1458 = vmatpush3.msra.mxu0 %v1190_v9 }
 0x1e3   :  { %1459 = vmatprep.subr.mxu0 %v1189_v10 }
 0x1e4   :  { %1460 = vmatpush3.msra.mxu0 %v1189_v10 }
 0x1e5   :  { %1461 = vmatprep.subr.mxu0 %v1188_v11 }
 0x1e6   :  { %1462 = vmatpush3.msra.mxu0 %v1188_v11 }
 0x1e7   :  { %1463 = vmatprep.subr.mxu0 %v1187_v12 }
 0x1e8   :  { %1464 = vmatpush3.msra.mxu0 %v1187_v12 }
 0x1e9   :  { %1465 = vmatprep.subr.mxu0 %v1186_v13 }
 0x1ea   :  { %1466 = vmatpush3.msra.mxu0 %v1186_v13 }
 0x1eb   :  { %1467 = vmatprep.subr.mxu0 %v1185_v14 }
 0x1ec   :  { %1468 = vmatpush3.msra.mxu0 %v1185_v14 }
 0x1ed   :  { %1469 = vmatprep.subr.mxu0 %v1184_v18 }
 0x1ee   :  { %1470 = vmatpush3.msra.mxu0 %v1184_v18 }
 0x1ef   :  { %1471 = vmatprep.subr.mxu0 %v1183_v20 }
 0x1f0   :  { %1472 = vmatpush3.msra.mxu0 %v1183_v20 }
 0x1f1   :  { %1473 = vmatprep.subr.mxu0 %v1182_v22 }
 0x1f2   :  { %1474 = vmatpush3.msra.mxu0 %v1182_v22 }
 0x1f3   :  { %1475 = vmatprep.subr.mxu0 %v1181_v24 }
 0x1f4   :  { %1476 = vmatpush3.msra.mxu0 %v1181_v24  ;;  %v1204_v24 = vld [vmem:[%s2125_s2 + $0x150] sm:$0xff] }
 0x1f5   :  { %1477 = vmatprep.subr.mxu0 %v1180_v26 }
 0x1f6   :  { %1478 = vmatpush3.msra.mxu0 %v1180_v26 }
 0x1f7   :  { %1479 = vmatprep.subr.mxu0 %v1179_v28 }
 0x1f8   :  { %1480 = vmatpush3.msra.mxu0 %v1179_v28  ;;  %v1201_v28 = vld [vmem:[%s2125_s2 + $0x138] sm:$0xff] }
 0x1f9   :  { %1481 = vmatprep.subr.mxu0 %v1178_v30 }
 0x1fa   :  { %1482 = vmatpush3.msra.mxu0 %v1178_v30 }
 0x1fb   :  { %1527 = vmatprep.subr.mxu0 %v1209_v34 }
 0x29b   :  { %v562_v57 = vpop.f32.mrf.mxu0 }
 0x29c   :  { %v567_v58 = vrot.slane %v562_v57, 1 }
 0x29d   :  { %v1450_v60 = vpop.f32.mrf.mxu0 }
 0x29e   :  { %v569_v61 = vmul.f32 %v567_v58, %v37_v40 }
 0x2a0   :  { %v570_v63 = vmul.f32 %v569_v61, %v562_v57  ;;  %v575_v0 = vrot.slane %v569_v61, %v2005_v59 }
 0x2a2   :  { %v571_v1 = vsub.f32 %v38_v62, %v570_v63  ;;  %v576_v2 = vmul.f32 %v575_v0, %v1875_v7  ;;  %v577_v4 = vmul.f32 %v575_v0, %v1873_v6  ;;  %v578_v5 = vmul.f32 %v575_v0, %v1885_v16  ;;  %v1208_v6 = vld [vmem:[%s2125_s2 + $0x170] sm:$0xff]  ;;  %v1207_v7 = vld [vmem:[%s2125_s2 + $0x168] sm:$0xff] }
 0x2a3   :  { %v579_v8 = vmul.f32 %v575_v0, %v1883_v15  ;;  %v1206_v15 = vld [vmem:[%s2125_s2 + $0x160] sm:$0xff] }
 0x2a4   :  { %v583_v9 = vrot.slane %v571_v1, %v2005_v59 }
 0x2a6   :  { %v584_v10 = vadd.f32 %v583_v9, %v576_v2  ;;  %v585_v11 = vadd.f32 %v583_v9, %v577_v4  ;;  %v586_v12 = vadd.f32 %v583_v9, %v578_v5  ;;  %v587_v13 = vadd.f32 %v583_v9, %v579_v8 }
 0x2a8   :  { %v588_v14 = vmax.f32 %v584_v10, 0.0  ;;  %v589_v17 = vmax.f32 %v585_v11, 0.0  ;;  %v590_v18 = vmax.f32 %v586_v12, 0.0  ;;  %v591_v19 = vmax.f32 %v587_v13, 0.0 }
 0x2aa   :  { %596 = vst [vmem:[#allocation3 + $0x1] sm:$0xff] %v588_v14  ;;  %597 = vst [vmem:[#allocation3 + $0x9] sm:$0xff] %v589_v17  ;;  %1483 = vmatprep.mubr.f32.mxu0 %v588_v14 }
 0x2ab   :  { %598 = vst [vmem:[#allocation3 + $0x19] sm:$0xff] %v590_v18  ;;  %599 = vst [vmem:[#allocation3 + $0x21] sm:$0xff] %v591_v19  ;;  %1484 = vmatmul.mubr.f32.vlgmr.msra.gmra.mxu0 %v589_v17 }
 0x2ac   :  { %1528 = vmatpush3.msra.mxu0 %v1209_v34  ;;  %1486 = vmatprep.mubr.f32.mxu0 %v590_v18 }
 0x2ad   :  { %1529 = vmatprep.subr.mxu0 %v1208_v6 }
 0x2ae   :  { %1530 = vmatpush3.msra.mxu0 %v1208_v6 }
 0x2af   :  { %1531 = vmatprep.subr.mxu0 %v1207_v7  ;;  %1487 = vmatmul.mubr.f32.gmra.mxu0 %v591_v19 }
 0x2b0   :  { %1532 = vmatpush3.msra.mxu0 %v1207_v7 }
 0x2b1   :  { %v602_v16 = vld [vmem:[#allocation3] sm:$0xff]  ;;  %v603_v20 = vld [vmem:[#allocation3 + $0x8] sm:$0xff]  ;;  %1533 = vmatprep.subr.mxu0 %v1206_v15 }
 0x2b2   :  { %1521 = vmatprep.mubr.f32.mxu1 %v602_v16  ;;  %v610_v22 = vld [vmem:[#allocation3 + $0x2] sm:$0xff]  ;;  %1534 = vmatpush3.msra.mxu0 %v1206_v15  ;;  %v604_v23 = vld [vmem:[#allocation3 + $0x18] sm:$0xff] }
 0x2b3   :  { %1522 = vmatmul.mubr.f32.vlgmr.msra.gmra.mxu1 %v603_v20  ;;  %1559 = vmatprep.mubr.f32.mxu0 %v610_v22  ;;  %v605_v26 = vld [vmem:[#allocation3 + $0x20] sm:$0xff] }
 0x2b4   :  { %1524 = vmatprep.mubr.f32.mxu1 %v604_v23  ;;  %1535 = vmatprep.subr.mxu0 %v1205_v21 }
 0x2b5   :  { %1536 = vmatpush3.msra.mxu0 %v1205_v21  ;;  %1566 = vmatpush3.msra.mxu1 %v1761_v41  ;;  %v1200_v41 = vld [vmem:[%s2125_s2 + $0x130] sm:$0xff] }
 0x2b6   :  { %1537 = vmatprep.subr.mxu0 %v1204_v24  ;;  %1567 = vmatprep.subr.mxu1 %v1611_v3 }
 0x2b7   :  { %1525 = vmatmul.mubr.f32.gmra.mxu1 %v605_v26  ;;  %1538 = vmatpush3.msra.mxu0 %v1204_v24 }
 0x2b8   :  { %1539 = vmatprep.subr.mxu0 %v1203_v25  ;;  %1568 = vmatpush3.msra.mxu1 %v1766_v42  ;;  %v1199_v42 = vld [vmem:[%s2125_s2 + $0x128] sm:$0xff] }
 0x2b9   :  { %1540 = vmatpush3.msra.mxu0 %v1203_v25  ;;  %1569 = vmatprep.subr.mxu1 %v1611_v3 }
 0x2ba   :  { %1541 = vmatprep.subr.mxu0 %v1202_v27  ;;  %1570 = vmatpush3.msra.mxu1 %v1775_v43  ;;  %v1198_v43 = vld [vmem:[%s2125_s2 + $0x120] sm:$0xff] }
 0x2bb   :  { %1542 = vmatpush3.msra.mxu0 %v1202_v27  ;;  %1571 = vmatprep.subr.mxu1 %v1611_v3 }
 0x2bc   :  { %1543 = vmatprep.subr.mxu0 %v1201_v28  ;;  %1572 = vmatpush3.msra.mxu1 %v1782_v44  ;;  %v1197_v44 = vld [vmem:[%s2125_s2 + $0x118] sm:$0xff] }
 0x2bd   :  { %1544 = vmatpush3.msra.mxu0 %v1201_v28  ;;  %1573 = vmatprep.subr.mxu1 %v1611_v3  ;;  %v600_v28 = vld [vmem:[%s2126_s3 + $0x2] sm:$0x1] }
 0x2be   :  { %1545 = vmatprep.subr.mxu0 %v1200_v41  ;;  %1574 = vmatpush3.msra.mxu1 %v1789_v45  ;;  %v1196_v45 = vld [vmem:[%s2125_s2 + $0x110] sm:$0xff] }
 0x2bf   :  { %1546 = vmatpush3.msra.mxu0 %v1200_v41  ;;  %1575 = vmatprep.subr.mxu1 %v1611_v3 }
 0x2c0   :  { %1547 = vmatprep.subr.mxu0 %v1199_v42  ;;  %1576 = vmatpush3.msra.mxu1 %v1796_v46  ;;  %v1195_v46 = vld [vmem:[%s2125_s2 + $0x108] sm:$0xff] }
 0x2c1   :  { %1548 = vmatpush3.msra.mxu0 %v1199_v42  ;;  %1577 = vmatprep.subr.mxu1 %v1611_v3 }
 0x2c2   :  { %1549 = vmatprep.subr.mxu0 %v1198_v43  ;;  %1578 = vmatpush3.msra.mxu1 %v1803_v47  ;;  %v1194_v47 = vld [vmem:[%s2125_s2 + $0x100] sm:$0xff] }
 0x2c3   :  { %1550 = vmatpush3.msra.mxu0 %v1198_v43  ;;  %1579 = vmatprep.subr.mxu1 %v1611_v3 }
 0x2c4   :  { %1551 = vmatprep.subr.mxu0 %v1197_v44  ;;  %1580 = vmatpush3.msra.mxu1 %v1810_v48  ;;  %v611_v48 = vld [vmem:[#allocation3 + $0xa] sm:$0xff] }
 0x2c5   :  { %1552 = vmatpush3.msra.mxu0 %v1197_v44  ;;  %1581 = vmatprep.subr.mxu1 %v1611_v3 }
 0x2c6   :  { %1553 = vmatprep.subr.mxu0 %v1196_v45  ;;  %1582 = vmatpush3.msra.mxu1 %v1817_v49  ;;  %v612_v49 = vld [vmem:[#allocation3 + $0x1a] sm:$0xff] }
 0x2c7   :  { %1554 = vmatpush3.msra.mxu0 %v1196_v45  ;;  %1583 = vmatprep.subr.mxu1 %v1611_v3  ;;  %v601_v45 = vld [vmem:[%s2126_s3 + $0x3] sm:$0x1] }
 0x2c8   :  { %1555 = vmatprep.subr.mxu0 %v1195_v46  ;;  %1584 = vmatpush3.msra.mxu1 %v1824_v50  ;;  %v613_v50 = vld [vmem:[#allocation3 + $0x22] sm:$0xff] }
 0x2c9   :  { %1556 = vmatpush3.msra.mxu0 %v1195_v46  ;;  %1585 = vmatprep.subr.mxu1 %v1611_v3 }
 0x2ca   :  { %1557 = vmatprep.subr.mxu0 %v1194_v47  ;;  %1586 = vmatpush3.msra.mxu1 %v1831_v51 }
 0x2cb   :  { %1558 = vmatpush3.msra.mxu0 %v1194_v47  ;;  %1587 = vmatprep.subr.mxu1 %v1611_v3 }
 0x2cc   :  { %1560 = vmatmul.mubr.f32.vlgmr.msra.gmra.mxu0 %v611_v48  ;;  %1588 = vmatpush3.msra.mxu1 %v1838_v52 }
 0x2cd   :  { %1562 = vmatprep.mubr.f32.mxu0 %v612_v49  ;;  %1589 = vmatprep.subr.mxu1 %v1611_v3 }
 0x2ce   :  { %1590 = vmatpush3.msra.mxu1 %v1844_v53  ;;  %1597 = vmatprep.mubr.msk.f32.mxu1 %vm1612_vm2, %v1611_v3 }
 0x2cf   :  { %1591 = vmatprep.subr.mxu1 %v1611_v3  ;;  %1600 = vmatprep.subr.mxu0 %v1611_v3 }
 0x2d0   :  { %1563 = vmatmul.mubr.f32.gmra.mxu0 %v613_v50  ;;  %1592 = vmatpush3.msra.mxu1 %v1850_v54 }
 0x2d1   :  { %1593 = vmatprep.subr.mxu1 %v1611_v3  ;;  %1601 = vmatpush3.msra.mxu0 %v1897_v37 }
 0x2d2   :  { %1594 = vmatpush3.msra.mxu1 %v1861_v55  ;;  %1602 = vmatprep.mubr.msk.f32.mxu0 %vm1612_vm2, %v1611_v3 }
 0x2d3   :  { %1595 = vmatprep.subr.mxu1 %v1611_v3 }
 0x2d4   :  { %1596 = vmatpush3.msra.mxu1 %v1868_v56 }
 0x36b   :  { %v1485_v51 = vpop.f32.mrf.mxu0 }
 0x36d   :  { %v713_v53 = vpop.f32.mrf.mxu0 }
 0x36f   :  { %v1488_v30 = vpop.f32.mrf.mxu0 }
 0x371   :  { %v723_v54 = vpop.f32.mrf.mxu0 }
 0x373   :  { %v1523_v52 = vpop.f32.mrf.mxu1 }
 0x374   :  { %v804_v33 = vadd.f32 %v1523_v52, %v1485_v51 }
 0x375   :  { %v798_v29 = vpop.f32.mrf.mxu1 }
 0x376   :  { %v799_v34 = vadd.f32 %v798_v29, %v713_v53 }
 0x377   :  { %v1526_v31 = vpop.f32.mrf.mxu1 }
 0x378   :  { %v814_v39 = vadd.f32 %v1526_v31, %v1488_v30 }
 0x379   :  { %v808_v37 = vpop.f32.mrf.mxu1 }
 0x37a   :  { %v809_v40 = vadd.f32 %v808_v37, %v723_v54 }
 0x38c   :  { %v1561_v32 = vpop.f32.mrf.mxu0 }
 0x38d   :  { %v920_v55 = vadd.f32 %v1561_v32, %v804_v33 }
 0x38e   :  { %v900_v35 = vpop.f32.mrf.mxu0 }
 0x38f   :  { %v919_v36 = vadd.f32 %v900_v35, %v799_v34  ;;  %v933_v56 = vmul.f32 %v920_v55, %v920_v55 }
 0x390   :  { %v1564_v38 = vpop.f32.mrf.mxu0 }
 0x391   :  { %v932_v3 = vmul.f32 %v919_v36, %v919_v36  ;;  %v923_v58 = vadd.f32 %v920_v55, %v919_v36  ;;  %v922_v60 = vadd.f32 %v1564_v38, %v814_v39 }
 0x392   :  { %v910_v57 = vpop.f32.mrf.mxu0 }
 0x393   :  { %v921_v61 = vadd.f32 %v910_v57, %v809_v40  ;;  %v936_v62 = vadd.f32 %v933_v56, %v932_v3  ;;  %v935_v1 = vmul.f32 %v922_v60, %v922_v60 }
 0x395   :  { %v924_v63 = vadd.f32 %v923_v58, %v921_v61  ;;  %v934_v0 = vmul.f32 %v921_v61, %v921_v61 }
 0x397   :  { %v925_v2 = vadd.f32 %v924_v63, %v922_v60  ;;  %v937_v4 = vadd.f32 %v936_v62, %v934_v0 }
 0x399   :  { %v926_v5 = vrot.slane %v925_v2, 4  ;;  %v938_v8 = vadd.f32 %v937_v4, %v935_v1 }
 0x39b   :  { %v927_v9 = vadd.f32 %v926_v5, %v925_v2  ;;  %v939_v10 = vrot.slane %v938_v8, 4 }
 0x39d   :  { %v928_v11 = vrot.slane %v927_v9, 2  ;;  %v940_v12 = vadd.f32 %v939_v10, %v938_v8 }
 0x39f   :  { %v929_v13 = vadd.f32 %v928_v11, %v927_v9  ;;  %v941_v14 = vrot.slane %v940_v12, 2 }
 0x3a1   :  { %v930_v17 = vrot.slane %v929_v13, 1  ;;  %v942_v18 = vadd.f32 %v941_v14, %v940_v12 }
 0x3a3   :  { %v943_v19 = vrot.slane %v942_v18, 1  ;;  %v931_v6 = vadd.f32 %v930_v17, %v929_v13 }
 0x3a5   :  { %v944_v7 = vadd.f32 %v943_v19, %v942_v18 }
 0x3a7   :  { %v945_v15 = vsel %vm394_vm3, %v931_v6, %v944_v7 }
 0x3a8   :  { %1598 = vmatmul.mubr.f32.vlgmr.msra.gmra.mxu1 %v945_v15 }
 0x468   :  { %v1028_v16 = vpop.f32.mrf.mxu1 }
 0x469   :  { %v1032_v20 = vmul.f32 0.001953125, %v1028_v16 }
 0x46a   :  { %v1599_v21 = vpop.f32.mrf.mxu1 }
 0x46b   :  { %v1033_v22 = vmul.f32 %v1032_v20, %v1032_v20 }
 0x46d   :  { %v1035_v23 = vrot.slane %v1033_v22, 7 }
 0x46f   :  { %v1037_v24 = vsub.f32 %v1032_v20, %v1035_v23 }
 0x471   :  { %v1038_v25 = vadd.f32 1e-05, %v1037_v24 }
 0x473   :  { %1609 = vrsqrt.f32 %v1038_v25 }
 0x480   :  { %v1610_v26 = vpop.eup %1609 }
 0x481   :  { %v1040_v27 = vsel %vm394_vm3, %v1032_v20, %v1610_v26 }
 0x482   :  { %1603 = vmatmul.mubr.msk.f32.vlgmr.msra.gmra.mxu0 %vm492_vm4, %v1040_v27 }
 0x542   :  { %v1111_v41 = vpop.f32.mrf.mxu0 }
 0x543   :  { %v1116_v42 = vrot.slane %v1111_v41, 1 }
 0x544   :  { %v1604_v43 = vpop.f32.mrf.mxu0 }
 0x545   :  { %v1118_v44 = vmul.f32 %v1116_v42, %v600_v28 }
 0x547   :  { %v1119_v46 = vmul.f32 %v1118_v44, %v1111_v41  ;;  %v1124_v47 = vrot.slane %v1118_v44, %v2005_v59 }
 0x549   :  { %v1120_v48 = vsub.f32 %v601_v45, %v1119_v46  ;;  %v1125_v49 = vmul.f32 %v1124_v47, %v919_v36  ;;  %v1126_v50 = vmul.f32 %v1124_v47, %v920_v55  ;;  %v1127_v51 = vmul.f32 %v1124_v47, %v921_v61 }
 0x54a   :  { %v1128_v52 = vmul.f32 %v1124_v47, %v922_v60 }
 0x54b   :  { %v1132_v53 = vrot.slane %v1120_v48, %v2005_v59 }
 0x54d   :  { %v1133_v29 = vadd.f32 %v1132_v53, %v1125_v49  ;;  %v1134_v30 = vadd.f32 %v1132_v53, %v1126_v50  ;;  %v1135_v31 = vadd.f32 %v1132_v53, %v1127_v51  ;;  %v1136_v54 = vadd.f32 %v1132_v53, %v1128_v52 }
 0x54f   :  { %v1137_v32 = vmax.f32 %v1133_v29, 0.0  ;;  %v1138_v33 = vmax.f32 %v1134_v30, 0.0  ;;  %v1139_v34 = vmax.f32 %v1135_v31, 0.0  ;;  %v1140_v37 = vmax.f32 %v1136_v54, 0.0 }
 0x551   :  { %1141 = vst [vmem:[%s2127_s6] sm:$0xff] %v1137_v32  ;;  %1142 = vst [vmem:[%s2127_s6 + $0x8] sm:$0xff] %v1138_v33 }
 0x552   :  { %1143 = vst [vmem:[%s2127_s6 + $0x10] sm:$0xff] %v1139_v34  ;;  %1144 = vst [vmem:[%s2127_s6 + $0x18] sm:$0xff] %v1140_v37 }

</bundles_post_ra>
